<compile_context>
chip_gen: v6e
topology: v6e:2x2x1
jax: 0.10.0
libtpu: 0.0.40
codegen_flags: <defaults>
</compile_context>

<pallas_src>
import functools

import jax
import jax.numpy as jnp
from jax.experimental import pallas as pl
from jax.experimental.pallas import tpu as pltpu


def _fused_mlp_kernel(*refs, activations, emit_intermediates):
    """One fused pass over the whole Linear+activation stack.

    refs = (x, W1, b1, ..., WL, bL, out...), where `out...` is one output per
    layer when emit_intermediates=True (cache=True path) or just the final
    post-activation output when emit_intermediates=False.
    """
    n = len(activations)
    x_ref = refs[0]
    param_refs = refs[1:1 + 2 * n]
    out_refs = refs[1 + 2 * n:]

    chain_dtype = x_ref.dtype  # MXU operand dtype for subsequent layers (f32 or bf16)
    h = x_ref[...]
    out_idx = 0
    for i, act in enumerate(activations):
        w = param_refs[2 * i][...]
        b = param_refs[2 * i + 1][...]
        # MXU matmul with f32 accumulation; bias + ReLU epilogue stays in f32
        # (v5e has no bf16 VPU path).
        acc = jnp.dot(h, w, preferred_element_type=jnp.float32)
        acc = acc + b.astype(jnp.float32)        # b is (1, N): broadcasts over rows
        if act == "relu":
            acc = jnp.maximum(acc, 0.0)
        elif act != "identity":
            raise ValueError(f"unknown activation: {act}")

        is_last = i == n - 1
        if is_last or emit_intermediates:
            out_refs[out_idx][...] = acc.astype(out_refs[out_idx].dtype)
            out_idx += 1
        if not is_last:
            # Next matmul consumes the compute dtype -- decoupled from the
            # stored output dtype (no silent precision loss if outputs change).
            h = acc.astype(chain_dtype)


def fused_mlp(x, layers, activations, *, cache=False, block_m=1024,
              compute_dtype=None):
    """Run the whole Linear+activation stack as a SINGLE pallas_call.

    x: [M, d_in]; layers: list of (W [K, N], b [N]).
    Returns (out_1, ..., out_L) when cache=True, else just (out_L,) -- the
    intermediates are never written to HBM when caching is off.
    compute_dtype (e.g. jnp.bfloat16) optionally casts x and the weights for
    the MXU operands; accumulation / epilogue / stored outputs stay in the
    original dtype.
    """
    if len(layers) != len(activations):
        raise ValueError("unequal number of layers and activations")
    M, d_in = x.shape
    out_dtype = x.dtype

    if compute_dtype is not None:
        x = x.astype(compute_dtype)
        layers = [(w.astype(compute_dtype), b) for (w, b) in layers]

    args = [x]
    for (w, b) in layers:
        args.append(w)
        args.append(b.reshape(1, -1))

    if cache:
        out_dims = [w.shape[1] for (w, _) in layers]
    else:
        out_dims = [layers[-1][0].shape[1]]
    out_shape = tuple(jax.ShapeDtypeStruct((M, d), out_dtype) for d in out_dims)

    kernel = functools.partial(
        _fused_mlp_kernel,
        activations=tuple(activations),
        emit_intermediates=cache,
    )

    # Advisory cost hint so XLA can schedule/overlap this small latency-bound call.
    flops = 2 * M * sum(w.shape[0] * w.shape[1] for (w, _) in layers)
    bytes_accessed = (
        x.size * x.dtype.itemsize
        + sum(w.size * w.dtype.itemsize + b.size * b.dtype.itemsize
              for (w, b) in layers)
        + sum(M * d * jnp.dtype(out_dtype).itemsize for d in out_dims)
    )
    cost = pl.CostEstimate(flops=flops, transcendentals=0,
                           bytes_accessed=bytes_accessed)

    if M <= 256:
        # Small batch: no grid, every operand is a whole-array VMEM block.
        # Footprint is tiny and bounded, so no scoped-VMEM risk here.
        vmem_spec = pl.BlockSpec(memory_space=pltpu.MemorySpace.VMEM)
        return pl.pallas_call(
            kernel,
            out_shape=out_shape,
            in_specs=[vmem_spec] * len(args),
            out_specs=tuple(vmem_spec for _ in out_shape),
            cost_estimate=cost,
        )(*args)

    # Large batch: 1-D "parallel" grid over rows, cdiv + masked last tile so any
    # M works and per-step VMEM stays bounded.  Weights/biases have constant
    # index_maps (grid-invariant -> VMEM-resident, no re-DMA per step).
    # block_m is capped at ~M/2 (multiple of 16) so v7x's two TensorCores
    # always get >= 2 parallel tiles.
    bm = min(block_m, max(16, (M // 2) // 16 * 16))
    grid = (pl.cdiv(M, bm),)

    in_specs = [pl.BlockSpec((bm, d_in), lambda i: (i, 0))]
    for (w, b) in layers:
        in_specs.append(pl.BlockSpec(w.shape, lambda i: (0, 0)))
        in_specs.append(pl.BlockSpec((1, b.shape[0]), lambda i: (0, 0)))
    out_specs = tuple(pl.BlockSpec((bm, d), lambda i: (i, 0)) for d in out_dims)

    return pl.pallas_call(
        kernel,
        out_shape=out_shape,
        grid=grid,
        in_specs=in_specs,
        out_specs=out_specs,
        cost_estimate=cost,
        compiler_params=pltpu.CompilerParams(
            dimension_semantics=("parallel",)  # v7x: shard row tiles over both TCs
        ),
    )(*args)


class SequentialPallas:
    """JAX/Pallas equivalent of torch_vr.sequential.Sequential.

    `layers` is a list of (W, b) tuples (W stored as [in_features, out_features],
    i.e. transposed vs. torch's [out, in]), `activations` is a list of
    activation names ("relu" | "identity").  Forward reproduces the caching
    semantics of the torch module: `self.inputs` holds the input to each layer
    (the final post-activation output is popped, exactly like the reference;
    with cache=False it ends up empty, matching the torch behavior).
    """

    def __init__(self, layers, activations, compute_dtype=None):
        if len(layers) != len(activations):
            raise ValueError("unequal number of layers and activations")
        self.layers = layers
        self.activations = activations
        self.compute_dtype = compute_dtype
        self.inputs = []
        self.outputs_grad = []

    def clear(self):
        self.inputs.clear()
        self.outputs_grad.clear()

    def forward(self, x, cache=False):
        self.clear()
        self.inputs.append(x)
        outs = fused_mlp(x, self.layers, self.activations, cache=cache,
                         compute_dtype=self.compute_dtype)
        if cache:
            self.inputs.extend(outs)
        self.inputs.pop()
        return outs[-1]

    __call__ = forward


def _init_linear(key, in_f, out_f, dtype=jnp.float32):
    kw, kb = jax.random.split(key)
    bound = 1.0 / (in_f ** 0.5)
    # Stored as [in_features, out_features] (transposed vs. torch's [out, in]).
    w = jax.random.uniform(kw, (in_f, out_f), dtype, minval=-bound, maxval=bound)
    b = jax.random.uniform(kb, (out_f,), dtype, minval=-bound, maxval=bound)
    return w, b


if __name__ == "__main__":
    key = jax.random.PRNGKey(0)
    k_x, k1, k2, k3, k_xl = jax.random.split(key, 5)

    batch, d_in, d_hid, d_out = 8, 32, 64, 16
    layers = [
        _init_linear(k1, d_in, d_hid),
        _init_linear(k2, d_hid, d_hid),
        _init_linear(k3, d_hid, d_out),
    ]
    activations = ["relu", "relu", "identity"]
    model = SequentialPallas(layers, activations)

    def ref_forward(xin):
        h = xin
        acts = []
        for (w, b), act in zip(layers, activations):
            h = h @ w + b
            if act == "relu":
                h = jnp.maximum(h, 0.0)
            acts.append(h)
        return acts

    # ---- small batch, cache=True: single fused gridless launch, 3 outputs ----
    x = jax.random.normal(k_x, (batch, d_in), jnp.float32)
    out = jax.block_until_ready(model(x, cache=True))
    refs = ref_forward(x)
    assert out.shape == (batch, d_out)
    assert jnp.allclose(out, refs[-1], atol=1e-5, rtol=1e-5)
    # torch caching semantics: inputs == [x, act1_out, act2_out]
    assert len(model.inputs) == 3
    assert jnp.allclose(model.inputs[1], refs[0], atol=1e-5, rtol=1e-5)
    assert jnp.allclose(model.inputs[2], refs[1], atol=1e-5, rtol=1e-5)

    # ---- larger, NON-divisible batch, cache=False: cdiv'd "parallel" grid with
    # ---- a masked last tile; only the final (M,16) output is written to HBM ----
    Ml = 517
    xl = jax.random.normal(k_xl, (Ml, d_in), jnp.float32)
    out_l = jax.block_until_ready(model(xl, cache=False))
    refs_l = ref_forward(xl)
    assert out_l.shape == (Ml, d_out)
    assert len(model.inputs) == 0  # cache=False -> empty, like the torch module
    assert jnp.allclose(out_l, refs_l[-1], atol=1e-5, rtol=1e-5)

    # ---- optional bf16 matmul operands (v6e/v7x input-streaming win):
    # ---- epilogue / stored outputs stay f32, only MXU rounding differs ----
    model_bf16 = SequentialPallas(layers, activations, compute_dtype=jnp.bfloat16)
    out_b = jax.block_until_ready(model_bf16(xl, cache=False))
    assert out_b.dtype == jnp.float32
    assert jnp.allclose(out_b, refs_l[-1], atol=1e-1, rtol=1e-1)

    print("KERNEL_OK")
</pallas_src>

<mosaic_0001>
module attributes {stable_mosaic.version = 11 : i64} {
  func.func @_fused_mlp_kernel(%arg0: memref<8x32xf32, #tpu.memory_space<vmem>>, %arg1: memref<32x64xf32, #tpu.memory_space<vmem>>, %arg2: memref<1x64xf32, #tpu.memory_space<vmem>>, %arg3: memref<64x64xf32, #tpu.memory_space<vmem>>, %arg4: memref<1x64xf32, #tpu.memory_space<vmem>>, %arg5: memref<64x16xf32, #tpu.memory_space<vmem>>, %arg6: memref<1x16xf32, #tpu.memory_space<vmem>>, %arg7: memref<8x64xf32, #tpu.memory_space<vmem>>, %arg8: memref<8x64xf32, #tpu.memory_space<vmem>>, %arg9: memref<8x16xf32, #tpu.memory_space<vmem>>) attributes {dimension_semantics = [], scalar_prefetch = 0 : i64, scratch_operands = 0 : i64, tpu.core_type = #tpu.core_type<tc>} {
    %c0 = arith.constant 0 : index
    %c0_0 = arith.constant 0 : index
    %0 = vector.load %arg0[%c0, %c0_0] : memref<8x32xf32, #tpu.memory_space<vmem>>, vector<8x32xf32>
    %c0_1 = arith.constant 0 : index
    %c0_2 = arith.constant 0 : index
    %1 = vector.load %arg1[%c0_1, %c0_2] : memref<32x64xf32, #tpu.memory_space<vmem>>, vector<32x64xf32>
    %c0_3 = arith.constant 0 : index
    %c0_4 = arith.constant 0 : index
    %2 = vector.load %arg2[%c0_3, %c0_4] : memref<1x64xf32, #tpu.memory_space<vmem>>, vector<1x64xf32>
    %cst = arith.constant dense<0.000000e+00> : vector<8x64xf32>
    %3 = tpu.matmul %0, %1, %cst {dimension_numbers = #tpu.dot_dimension_numbers<[1], [0], [0], [1], [0, 0, 1, 1], [], []>} : vector<8x32xf32>, vector<32x64xf32>, vector<8x64xf32> -> vector<8x64xf32>
    %4 = vector.broadcast %2 : vector<1x64xf32> to vector<8x64xf32>
    %5 = arith.addf %3, %4 : vector<8x64xf32>
    %cst_5 = arith.constant 0.000000e+00 : f32
    %6 = vector.broadcast %cst_5 : f32 to vector<8x64xf32>
    %7 = arith.maximumf %5, %6 : vector<8x64xf32>
    %c0_6 = arith.constant 0 : index
    %c0_7 = arith.constant 0 : index
    %8 = vector.load %arg7[%c0_6, %c0_7] : memref<8x64xf32, #tpu.memory_space<vmem>>, vector<8x64xf32>
    tpu.vector_store %arg7[%c0_6, %c0_7], %7 {strides = array<i32>} : memref<8x64xf32, #tpu.memory_space<vmem>>, vector<8x64xf32>,
    %c0_8 = arith.constant 0 : index
    %c0_9 = arith.constant 0 : index
    %9 = vector.load %arg3[%c0_8, %c0_9] : memref<64x64xf32, #tpu.memory_space<vmem>>, vector<64x64xf32>
    %c0_10 = arith.constant 0 : index
    %c0_11 = arith.constant 0 : index
    %10 = vector.load %arg4[%c0_10, %c0_11] : memref<1x64xf32, #tpu.memory_space<vmem>>, vector<1x64xf32>
    %cst_12 = arith.constant dense<0.000000e+00> : vector<8x64xf32>
    %11 = tpu.matmul %7, %9, %cst_12 {dimension_numbers = #tpu.dot_dimension_numbers<[1], [0], [0], [1], [0, 0, 1, 1], [], []>} : vector<8x64xf32>, vector<64x64xf32>, vector<8x64xf32> -> vector<8x64xf32>
    %12 = vector.broadcast %10 : vector<1x64xf32> to vector<8x64xf32>
    %13 = arith.addf %11, %12 : vector<8x64xf32>
    %cst_13 = arith.constant 0.000000e+00 : f32
    %14 = vector.broadcast %cst_13 : f32 to vector<8x64xf32>
    %15 = arith.maximumf %13, %14 : vector<8x64xf32>
    %c0_14 = arith.constant 0 : index
    %c0_15 = arith.constant 0 : index
    %16 = vector.load %arg8[%c0_14, %c0_15] : memref<8x64xf32, #tpu.memory_space<vmem>>, vector<8x64xf32>
    tpu.vector_store %arg8[%c0_14, %c0_15], %15 {strides = array<i32>} : memref<8x64xf32, #tpu.memory_space<vmem>>, vector<8x64xf32>,
    %c0_16 = arith.constant 0 : index
    %c0_17 = arith.constant 0 : index
    %17 = vector.load %arg5[%c0_16, %c0_17] : memref<64x16xf32, #tpu.memory_space<vmem>>, vector<64x16xf32>
    %c0_18 = arith.constant 0 : index
    %c0_19 = arith.constant 0 : index
    %18 = vector.load %arg6[%c0_18, %c0_19] : memref<1x16xf32, #tpu.memory_space<vmem>>, vector<1x16xf32>
    %cst_20 = arith.constant dense<0.000000e+00> : vector<8x16xf32>
    %19 = tpu.matmul %15, %17, %cst_20 {dimension_numbers = #tpu.dot_dimension_numbers<[1], [0], [0], [1], [0, 0, 1, 1], [], []>} : vector<8x64xf32>, vector<64x16xf32>, vector<8x16xf32> -> vector<8x16xf32>
    %20 = vector.broadcast %18 : vector<1x16xf32> to vector<8x16xf32>
    %21 = arith.addf %19, %20 : vector<8x16xf32>
    %c0_21 = arith.constant 0 : index
    %c0_22 = arith.constant 0 : index
    %22 = vector.load %arg9[%c0_21, %c0_22] : memref<8x16xf32, #tpu.memory_space<vmem>>, vector<8x16xf32>
    tpu.vector_store %arg9[%c0_21, %c0_22], %21 {strides = array<i32>} : memref<8x16xf32, #tpu.memory_space<vmem>>, vector<8x16xf32>,
    return
  }
}

</mosaic_0001>

<bundles_post_ra>
// kernel: tpu_custom_call.1
= control target key start
LH: loop header
LB: loop body
LE: loop exit
PB: predicated region body
PF: predicated region fallthrough
CT: control target
= control target key end

     0   :  { %15 = vsyncpa [#allocation3], 0  ;;  %s688_s0 = inlined_call_operand.vmem [shape: f32[8,32], index: 0, kind: input, shape index: {}]   ;;  %s689_s1 = inlined_call_operand.hbm [shape: f32[32,64], index: 1, kind: input, shape index: {}]   ;;  %s690_s2 = inlined_call_operand.vmem [shape: f32[1,64], index: 2, kind: input, shape index: {}]   ;;  %s691_s3 = inlined_call_operand.vmem [shape: f32[64,64], index: 3, kind: input, shape index: {}]   ;;  %s692_s4 = inlined_call_operand.vmem [shape: f32[1,64], index: 4, kind: input, shape index: {}]   ;;  %s693_s5 = inlined_call_operand.vmem [shape: f32[64,16], index: 5, kind: input, shape index: {}]   ;;  %s694_s6 = inlined_call_operand.vmem [shape: f32[1,16], index: 6, kind: input, shape index: {}]   ;;  %s695_s7 = inlined_call_operand.hbm [shape: f32[8,64], index: 7, kind: output, shape index: {0}]   ;;  %s696_s8 = inlined_call_operand.hbm [shape: f32[8,64], index: 8, kind: output, shape index: {1}]   ;;  %s697_s9 = inlined_call_operand.hbm [shape: f32[8,16], index: 9, kind: output, shape index: {2}]  }
   0x1   :  { %16 = vsyncpa [#allocation4], 0 }
   0x2   :  { %17 = vsyncpa [#allocation7], 0  ;;  %s528_s30 = smov [#allocation2]  }
   0x3   :  { %s25_s10 = sshll.u32 %s528_s30, 4  ;;  %s26_s10 = int_to_ptr.vmem [resolvable:$true] %s25_s10 }
   0x4   :  { %s450_s11 = scalar_lea.vmem %s26_s10, 512  ;;  %p455_p1 = scmp.lt.s32.totalorder %s26_s10, %s26_s10 }
   0x5   :  { %p451_p0 = scmp.ne.s32.totalorder %s26_s10, %s450_s11  ;;  %p456_p2 = scmp.lt.s32.totalorder %s450_s11, %s450_s11 }
   0x7   :  { %p457_p3 = por %p456_p2, %p455_p1 }
   0x9   :  { %p458_p4 = pnand %p457_p3, %p451_p0 }
   0xb   :  { %461 = shalt.err (!%p458_p4)
}
   0xc   :  { %s529_s12 = smov 128   ;;  %s530_s13 = smov 8  }
   0xd   :  { %31 = dma.hbm_to_vmem [thread:$0]  %s689_s1, 512, %s26_s10, [#allocation3], %s529_s12, %s529_s12, %s530_s13  }
   0xe   :  { %522 = dma.done.wait [#allocation3], 512  }
   0xf   :  { %523 = vsyncadd [#allocation3], 4294966784  ;;  %v531_v0 = vmov 0.0   ;;  %vm532_vm0 = vmmov 0   ;;  %v49_v1 = vld [vmem:[#allocation2 + $0x18] sm:$0xff]  ;;  %v48_v2 = vld [vmem:[#allocation2 + $0x10] sm:$0xff] }
  0x10   :  { %385 = vmatprep.subr.mxu0 %v531_v0  ;;  %393 = vmatprep.mubr.msk.f32.mxu0 %vm532_vm0, %v531_v0  ;;  %v141_v3 = vld [vmem:[%s691_s3 + $0x38] sm:$0xff]  ;;  %v47_v4 = vld [vmem:[#allocation2 + $0x8] sm:$0xff]  ;;  %v140_v5 = vld [vmem:[%s691_s3 + $0x30] sm:$0xff]  ;;  %vm57_vm1 = vcmask 261120   ;;  %vm132_vm2 = vcmask 523264   ;;  %s533_s27 = smov [#allocation6]  }
  0x11   :  { %396 = vmatprep.subr.mxu1 %v531_v0  ;;  %412 = vmatprep.mubr.msk.f32.mxu1 %vm532_vm0, %v531_v0  ;;  %v139_v6 = vld [vmem:[%s691_s3 + $0x28] sm:$0xff]  ;;  %v46_v7 = vld [vmem:[#allocation2] sm:$0xff]  ;;  %v137_v10 = vld [vmem:[%s691_s3 + $0x18] sm:$0xff]  ;;  %s330_s28 = sshll.u32 %s533_s27, 4  ;;  %s534_s29 = smov [#allocation5]   ;;  %s331_s28 = int_to_ptr.vmem [resolvable:$true] %s330_s28 }
  0x12   :  { %386 = vmatpush3.msra.mxu0 %v49_v1  ;;  %397 = vmatpush3.msra.mxu1 %v141_v3  ;;  %v45_v8 = vld [vmem:[%s688_s0] sm:$0xff]  ;;  %v136_v11 = vld [vmem:[%s691_s3 + $0x10] sm:$0xff]  ;;  %v135_v12 = vld [vmem:[%s691_s3 + $0x8] sm:$0xff]  ;;  %s320_s30 = sshll.u32 %s534_s29, 4  ;;  %s462_s10 = scalar_lea.vmem %s331_s28, 128  ;;  %s321_s30 = int_to_ptr.vmem [resolvable:$true] %s320_s30 }
  0x13   :  { %387 = vmatprep.subr.mxu0 %v531_v0  ;;  %398 = vmatprep.subr.mxu1 %v531_v0  ;;  %v138_v9 = vld [vmem:[%s691_s3 + $0x20] sm:$0xff]  ;;  %v231_v14 = vld [vmem:[%s693_s5 + $0x38] sm:$0xff]  ;;  %v230_v15 = vld [vmem:[%s693_s5 + $0x30] sm:$0xff]  ;;  %p463_p5 = scmp.ne.s32.totalorder %s331_s28, %s462_s10  ;;  %p467_p6 = scmp.lt.s32.totalorder %s331_s28, %s331_s28 }
  0x14   :  { %388 = vmatpush3.msra.mxu0 %v48_v2  ;;  %399 = vmatpush3.msra.mxu1 %v140_v5  ;;  %v134_v13 = vld [vmem:[%s691_s3] sm:$0xff]  ;;  %v229_v16 = vld [vmem:[%s693_s5 + $0x28] sm:$0xff]  ;;  %v227_v18 = vld [vmem:[%s693_s5 + $0x18] sm:$0xff]  ;;  %p468_p7 = scmp.lt.s32.totalorder %s462_s10, %s462_s10 }
  0x15   :  { %389 = vmatprep.subr.mxu0 %v531_v0  ;;  %400 = vmatprep.subr.mxu1 %v531_v0  ;;  %v228_v17 = vld [vmem:[%s693_s5 + $0x20] sm:$0xff]  ;;  %v226_v24 = vld [vmem:[%s693_s5 + $0x10] sm:$0xff]  ;;  %v225_v25 = vld [vmem:[%s693_s5 + $0x8] sm:$0xff] }
  0x16   :  { %390 = vmatpush3.msra.mxu0 %v47_v4  ;;  %401 = vmatpush3.msra.mxu1 %v139_v6  ;;  %v356_v19 = vld [vmem:[%s690_s2] ss:$0 sm:$0xff]  ;;  %p469_p8 = por %p468_p7, %p467_p6 }
  0x17   :  { %391 = vmatprep.subr.mxu0 %v531_v0  ;;  %402 = vmatprep.subr.mxu1 %v531_v0  ;;  %v224_v26 = vld [vmem:[%s693_s5] sm:$0xff] }
  0x18   :  { %392 = vmatpush3.msra.mxu0 %v46_v7  ;;  %403 = vmatpush3.msra.mxu1 %v138_v9  ;;  %v358_v27 = vld [vmem:[%s692_s4] ss:$0 sm:$0xff]  ;;  %p470_p9 = pnand %p469_p8, %p463_p5 }
  0x19   :  { %394 = vmatmul.mubr.msk.f32.vlgmr.msra.gmra.mxu0 %vm57_vm1, %v45_v8  ;;  %404 = vmatprep.subr.mxu1 %v531_v0 }
  0x1a   :  { %415 = vmatprep.subr.mxu0 %v531_v0  ;;  %405 = vmatpush3.msra.mxu1 %v137_v10 }
  0x1b   :  { %431 = vmatprep.mubr.msk.f32.mxu0 %vm532_vm0, %v531_v0  ;;  %406 = vmatprep.subr.mxu1 %v531_v0 }
  0x1c   :  { %407 = vmatpush3.msra.mxu1 %v136_v11  ;;  %416 = vmatpush3.msra.mxu0 %v231_v14 }
  0x1d   :  { %408 = vmatprep.subr.mxu1 %v531_v0  ;;  %417 = vmatprep.subr.mxu0 %v531_v0 }
  0x1e   :  { %409 = vmatpush3.msra.mxu1 %v135_v12  ;;  %418 = vmatpush3.msra.mxu0 %v230_v15 }
  0x1f   :  { %410 = vmatprep.subr.mxu1 %v531_v0  ;;  %419 = vmatprep.subr.mxu0 %v531_v0 }
  0x20   :  { %411 = vmatpush3.msra.mxu1 %v134_v13  ;;  %420 = vmatpush3.msra.mxu0 %v229_v16 }
  0x21   :  { %421 = vmatprep.subr.mxu0 %v531_v0 }
  0x22   :  { %422 = vmatpush3.msra.mxu0 %v228_v17 }
  0x23   :  { %423 = vmatprep.subr.mxu0 %v531_v0 }
  0x24   :  { %424 = vmatpush3.msra.mxu0 %v227_v18 }
  0x25   :  { %425 = vmatprep.subr.mxu0 %v531_v0 }
  0x26   :  { %426 = vmatpush3.msra.mxu0 %v226_v24 }
  0x27   :  { %427 = vmatprep.subr.mxu0 %v531_v0 }
  0x28   :  { %428 = vmatpush3.msra.mxu0 %v225_v25 }
  0x29   :  { %429 = vmatprep.subr.mxu0 %v531_v0 }
  0x2a   :  { %430 = vmatpush3.msra.mxu0 %v224_v26 }
  0xd9   :  { %v127_v20 = vpop.f32.mrf.mxu0 }
  0xda   :  { %v128_v21 = vadd.f32 %v356_v19, %v127_v20 }
  0xdb   :  { %v395_v22 = vpop.f32.mrf.mxu0 }
  0xdc   :  { %v131_v23 = vmax.f32 %v128_v21, 0.0 }
  0xde   :  { %413 = vmatmul.mubr.msk.f32.vlgmr.msra.gmra.mxu1 %vm132_vm2, %v131_v23  ;;  %133 = vst.msk [vmem:[#allocation5] sm:$0xff] %vm132_vm2, %v131_v23 }
 0x19e   :  { %v218_v28 = vpop.f32.mrf.mxu1 }
 0x19f   :  { %v219_v29 = vadd.f32 %v358_v27, %v218_v28 }
 0x1a0   :  { %v414_v30 = vpop.f32.mrf.mxu1 }
 0x1a1   :  { %v222_v31 = vmax.f32 %v219_v29, 0.0 }
 0x1a3   :  { %223 = vst.msk [vmem:[#allocation6] sm:$0xff] %vm132_vm2, %v222_v31  ;;  %432 = vmatmul.mubr.msk.f32.vlgmr.msra.gmra.mxu0 %vm132_vm2, %v222_v31 }
 0x1a4   :  { %473 = shalt.err (!%p470_p9)
}
 0x1a5   :  { %333 = dma.vmem_to_hbm [thread:$0]  %s331_s28, 128, %s696_s8, [#allocation7]  }
 0x1a6   :  { %s482_s11 = scalar_lea.vmem %s321_s30, 128  ;;  %p487_p11 = scmp.lt.s32.totalorder %s321_s30, %s321_s30 }
 0x1a7   :  { %p483_p10 = scmp.ne.s32.totalorder %s321_s30, %s482_s11  ;;  %p488_p12 = scmp.lt.s32.totalorder %s482_s11, %s482_s11 }
 0x1a9   :  { %p489_p13 = por %p488_p12, %p487_p11 }
 0x1ab   :  { %p490_p0 = pnand %p489_p13, %p483_p10 }
 0x1ad   :  { %493 = shalt.err (!%p490_p0)
}
 0x1ae   :  { %323 = dma.vmem_to_hbm [thread:$0]  %s321_s30, 128, %s695_s7, [#allocation4]   ;;  %v360_v32 = vld [vmem:[%s694_s6] ss:$0 sm:$0xff]  ;;  %vm312_vm3 = vcmask 130048  }
 0x1af   :  { %s535_s16 = smov [#allocation8]  }
 0x1b0   :  { %s340_s3 = sshll.u32 %s535_s16, 4  ;;  %s341_s3 = int_to_ptr.vmem [resolvable:$true] %s340_s3 }
 0x1b1   :  { %s502_s8 = scalar_lea.vmem %s341_s3, 128  ;;  %p507_p2 = scmp.lt.s32.totalorder %s341_s3, %s341_s3 }
 0x1b2   :  { %p503_p1 = scmp.ne.s32.totalorder %s341_s3, %s502_s8  ;;  %p508_p3 = scmp.lt.s32.totalorder %s502_s8, %s502_s8 }
 0x1b4   :  { %p509_p4 = por %p508_p3, %p507_p2 }
 0x1b6   :  { %p510_p5 = pnand %p509_p4, %p503_p1 }
 0x263   :  { %v308_v33 = vpop.f32.mrf.mxu0 }
 0x264   :  { %v309_v34 = vadd.f32 %v360_v32, %v308_v33 }
 0x265   :  { %v433_v35 = vpop.f32.mrf.mxu0 }
 0x266   :  { %313 = vst.msk [vmem:[#allocation8] sm:$0xff] %vm312_vm3, %v309_v34 }
 0x267   :  { %513 = shalt.err (!%p510_p5)
}
 0x268   :  { %343 = dma.vmem_to_hbm [thread:$0]  %s341_s3, 128, %s697_s9, [#allocation7]  }
 0x269   :  { %524 = dma.done.wait [#allocation4], 128  }
 0x26a   :  { %525 = vsyncadd [#allocation4], 4294967168 }
 0x26b   :  { %526 = dma.done.wait [#allocation7], 256  }
 0x26c   :  { %527 = vsyncadd [#allocation7], 4294967040 }
 0x26d   :  { %353 = vsyncpa [#allocation3], 1 }
 0x26e   :  { %354 = vsyncpa [#allocation4], 1 }
 0x26f   :  { %355 = vsyncpa [#allocation7], 1 }

</bundles_post_ra>
